<compile_context>
chip_gen: v7x
topology: tpu7x:2x2x1
jax: 0.10.0
libtpu: 0.0.40
codegen_flags: <defaults>
</compile_context>

<pallas_src>
import functools
import math

import jax
import jax.numpy as jnp
from jax import lax
from jax.experimental import pallas as pl
from jax.experimental.pallas import tpu as pltpu

_LANE = 128
_SUBLANE = 8
_TARGET_TILE_BYTES = 2 * 1024 * 1024  # ~2 MiB per input row-tile (f32 budget)


def _layernorm_kernel(x_ref, w_ref, b_ref, o_ref, *, eps, true_feat):
    # x_ref: (TB, Fp) row tile; w_ref/b_ref: (1, Fp) resident gamma/beta.
    x = x_ref[...].astype(jnp.float32)
    w = w_ref[...].astype(jnp.float32)
    b = b_ref[...].astype(jnp.float32)

    inv_n = jnp.float32(1.0 / true_feat)
    # Single traversal: sum and sum-of-squares. Padded lanes are zeros -> contribute 0
    # to both sums; divide by the TRUE feature count.
    s = jnp.sum(x, axis=-1, keepdims=True)
    ss = jnp.sum(x * x, axis=-1, keepdims=True)
    mean = s * inv_n
    var = jnp.maximum(ss * inv_n - mean * mean, jnp.float32(0.0))
    inv = lax.rsqrt(var + jnp.float32(eps))

    y = (x - mean) * inv * w + b
    o_ref[...] = y.astype(o_ref.dtype)


def _round_up(v, m):
    return ((v + m - 1) // m) * m


def layer_norm_pallas(x, weight, bias, eps=1e-5):
    """LayerNorm over all dims except dim 0 (PyTorch F.layer_norm(x, x.shape[1:], w, b, eps))."""
    orig_shape = x.shape
    batch = orig_shape[0]
    feat = math.prod(orig_shape[1:])

    # Lane-dense feature axis: pad flattened F up to a multiple of 128 so the output
    # store is unmasked `vst` (lane-dense out_spec is the biggest single lever).
    feat_pad = _round_up(feat, _LANE)

    # Row-tile sizing: ~2 MiB f32 tiles, rows a multiple of 8 sublanes. With double
    # buffering this keeps (2*in + 2*out) tiles + f32 temps well under the scoped
    # VMEM budget on v5e/v6e/v7x.
    rows_budget = max(_SUBLANE,
                      (_TARGET_TILE_BYTES // (feat_pad * 4)) // _SUBLANE * _SUBLANE)
    tb = min(rows_budget, _round_up(batch, _SUBLANE))
    batch_pad = _round_up(batch, tb)
    # TODO(synk): for extremely large F (8 * feat_pad * 4B approaching the VMEM budget)
    # a feature-chunked two-pass variant (accumulate sum/sumsq over F chunks) is needed.

    x2 = x.reshape(batch, feat)
    w2 = weight.reshape(1, feat)
    b2 = bias.reshape(1, feat)
    if batch_pad != batch or feat_pad != feat:
        x2 = jnp.pad(x2, ((0, batch_pad - batch), (0, feat_pad - feat)))
    if feat_pad != feat:
        w2 = jnp.pad(w2, ((0, 0), (0, feat_pad - feat)))
        b2 = jnp.pad(b2, ((0, 0), (0, feat_pad - feat)))

    kernel = functools.partial(_layernorm_kernel, eps=eps, true_feat=feat)
    grid = (batch_pad // tb,)

    out = pl.pallas_call(
        kernel,
        out_shape=jax.ShapeDtypeStruct((batch_pad, feat_pad), x.dtype),
        grid_spec=pltpu.PrefetchScalarGridSpec(
            num_scalar_prefetch=0,
            grid=grid,
            in_specs=[
                pl.BlockSpec((tb, feat_pad), lambda i: (i, 0)),   # pipelined row tiles
                pl.BlockSpec((1, feat_pad), lambda i: (0, 0)),    # gamma, resident
                pl.BlockSpec((1, feat_pad), lambda i: (0, 0)),    # beta, resident
            ],
            out_specs=pl.BlockSpec((tb, feat_pad), lambda i: (i, 0)),
        ),
        compiler_params=pltpu.CompilerParams(
            dimension_semantics=("parallel",),       # rows independent -> megacore on v7x
            vmem_limit_bytes=32 * 1024 * 1024,
        ),
    )(x2, w2, b2)

    out = out[:batch, :feat]
    return out.reshape(orig_shape)


def layer_norm_reference(x, weight, bias, eps=1e-5):
    # Pure-JAX reference replicating F.layer_norm over all non-batch dims (centered form).
    orig_shape = x.shape
    batch = orig_shape[0]
    x2 = x.reshape(batch, -1).astype(jnp.float32)
    mean = jnp.mean(x2, axis=-1, keepdims=True)
    var = jnp.mean((x2 - mean) ** 2, axis=-1, keepdims=True)
    y = (x2 - mean) / jnp.sqrt(var + eps)
    y = y * weight.reshape(1, -1).astype(jnp.float32) + bias.reshape(1, -1).astype(jnp.float32)
    return y.reshape(orig_shape).astype(x.dtype)


if __name__ == "__main__":
    key = jax.random.PRNGKey(0)

    # Case 1: NCHW with lane-dense flattened feature dim (C*H*W = 1024).
    B, C, H, W = 2, 4, 16, 16
    k1, k2, k3 = jax.random.split(key, 3)
    x1 = jax.random.normal(k1, (B, C, H, W), dtype=jnp.float32)
    w1 = jnp.ones((C, H, W), dtype=jnp.float32)   # reset_parameters: ones / zeros
    b1 = jnp.zeros((C, H, W), dtype=jnp.float32)

    out1 = jax.block_until_ready(layer_norm_pallas(x1, w1, b1, eps=1e-5))
    ref1 = layer_norm_reference(x1, w1, b1, eps=1e-5)
    assert out1.shape == x1.shape
    assert jnp.allclose(out1, ref1, atol=2e-5, rtol=2e-5), "mismatch vs reference (case 1)"

    # Case 2: non-128-multiple feature dim (C*H*W = 300) exercises lane/row padding path,
    # with non-trivial affine params.
    B2, C2, H2, W2 = 3, 3, 10, 10
    x2 = jax.random.normal(k2, (B2, C2, H2, W2), dtype=jnp.float32)
    w2 = 1.0 + 0.1 * jax.random.normal(k3, (C2, H2, W2), dtype=jnp.float32)
    b2 = 0.05 * jnp.ones((C2, H2, W2), dtype=jnp.float32)

    out2 = jax.block_until_ready(layer_norm_pallas(x2, w2, b2, eps=1e-5))
    ref2 = layer_norm_reference(x2, w2, b2, eps=1e-5)
    assert out2.shape == x2.shape
    assert jnp.allclose(out2, ref2, atol=2e-5, rtol=2e-5), "mismatch vs reference (case 2)"

    print("KERNEL_OK")
</pallas_src>

<mosaic_0001>
module attributes {stable_mosaic.version = 11 : i64} {
  func.func @_layernorm_kernel(%arg0: i32, %arg1: memref<8x1024xf32, #tpu.memory_space<vmem>>, %arg2: memref<1x1024xf32, #tpu.memory_space<vmem>>, %arg3: memref<1x1024xf32, #tpu.memory_space<vmem>>, %arg4: memref<8x1024xf32, #tpu.memory_space<vmem>>) attributes {dimension_semantics = [#tpu.dimension_semantics<parallel>], iteration_bounds = array<i64: 1>, scalar_prefetch = 0 : i64, scratch_operands = 0 : i64, tpu.core_type = #tpu.core_type<tc>, window_params = [{transform_indices = @transform_0, window_bounds = array<i64: 8, 1024>}, {pipeline_mode = #tpu.pipeline_mode<synchronous>, transform_indices = @transform_1, window_bounds = array<i64: 1, 1024>}, {pipeline_mode = #tpu.pipeline_mode<synchronous>, transform_indices = @transform_2, window_bounds = array<i64: 1, 1024>}, {transform_indices = @transform_3, window_bounds = array<i64: 8, 1024>}]} {
    %c0 = arith.constant 0 : index
    %c0_0 = arith.constant 0 : index
    %0 = vector.load %arg1[%c0, %c0_0] : memref<8x1024xf32, #tpu.memory_space<vmem>>, vector<8x1024xf32>
    %c0_1 = arith.constant 0 : index
    %c0_2 = arith.constant 0 : index
    %1 = vector.load %arg2[%c0_1, %c0_2] : memref<1x1024xf32, #tpu.memory_space<vmem>>, vector<1x1024xf32>
    %c0_3 = arith.constant 0 : index
    %c0_4 = arith.constant 0 : index
    %2 = vector.load %arg3[%c0_3, %c0_4] : memref<1x1024xf32, #tpu.memory_space<vmem>>, vector<1x1024xf32>
    %cst = arith.constant dense<0.000000e+00> : vector<8xf32>
    %3 = vector.multi_reduction <add>, %0, %cst [1] : vector<8x1024xf32> to vector<8xf32>
    %4 = vector.shape_cast %3 : vector<8xf32> to vector<8x1xf32>
    %5 = arith.mulf %0, %0 : vector<8x1024xf32>
    %cst_5 = arith.constant dense<0.000000e+00> : vector<8xf32>
    %6 = vector.multi_reduction <add>, %5, %cst_5 [1] : vector<8x1024xf32> to vector<8xf32>
    %7 = vector.shape_cast %6 : vector<8xf32> to vector<8x1xf32>
    %cst_6 = arith.constant 9.765625E-4 : f32
    %8 = vector.broadcast %cst_6 : f32 to vector<8x1xf32>
    %9 = arith.mulf %4, %8 : vector<8x1xf32>
    %cst_7 = arith.constant 9.765625E-4 : f32
    %10 = vector.broadcast %cst_7 : f32 to vector<8x1xf32>
    %11 = arith.mulf %7, %10 : vector<8x1xf32>
    %12 = arith.mulf %9, %9 : vector<8x1xf32>
    %13 = arith.subf %11, %12 : vector<8x1xf32>
    %cst_8 = arith.constant 0.000000e+00 : f32
    %14 = vector.broadcast %cst_8 : f32 to vector<8x1xf32>
    %15 = arith.maximumf %13, %14 : vector<8x1xf32>
    %cst_9 = arith.constant 9.99999974E-6 : f32
    %16 = vector.broadcast %cst_9 : f32 to vector<8x1xf32>
    %17 = arith.addf %15, %16 : vector<8x1xf32>
    %18 = math.rsqrt %17 : vector<8x1xf32>
    %19 = vector.broadcast %9 : vector<8x1xf32> to vector<8x1024xf32>
    %20 = arith.subf %0, %19 : vector<8x1024xf32>
    %21 = vector.broadcast %18 : vector<8x1xf32> to vector<8x1024xf32>
    %22 = arith.mulf %20, %21 : vector<8x1024xf32>
    %23 = vector.broadcast %1 : vector<1x1024xf32> to vector<8x1024xf32>
    %24 = arith.mulf %22, %23 : vector<8x1024xf32>
    %25 = vector.broadcast %2 : vector<1x1024xf32> to vector<8x1024xf32>
    %26 = arith.addf %24, %25 : vector<8x1024xf32>
    %c0_10 = arith.constant 0 : index
    %c0_11 = arith.constant 0 : index
    %27 = vector.load %arg4[%c0_10, %c0_11] : memref<8x1024xf32, #tpu.memory_space<vmem>>, vector<8x1024xf32>
    tpu.vector_store %arg4[%c0_10, %c0_11], %26 {strides = array<i32>} : memref<8x1024xf32, #tpu.memory_space<vmem>>, vector<8x1024xf32>,
    return
  }
  func.func @transform_0(%arg0: i32) -> (i32, i32) {
    %c0_i32 = arith.constant 0 : i32
    %c0_i32_0 = arith.constant 0 : i32
    return %arg0, %c0_i32 : i32, i32
  }
  func.func @transform_1(%arg0: i32) -> (i32, i32) {
    %c0_i32 = arith.constant 0 : i32
    %c0_i32_0 = arith.constant 0 : i32
    %c0_i32_1 = arith.constant 0 : i32
    return %c0_i32, %c0_i32_0 : i32, i32
  }
  func.func @transform_2(%arg0: i32) -> (i32, i32) {
    %c0_i32 = arith.constant 0 : i32
    %c0_i32_0 = arith.constant 0 : i32
    %c0_i32_1 = arith.constant 0 : i32
    return %c0_i32, %c0_i32_0 : i32, i32
  }
  func.func @transform_3(%arg0: i32) -> (i32, i32) {
    %c0_i32 = arith.constant 0 : i32
    %c0_i32_0 = arith.constant 0 : i32
    return %arg0, %c0_i32 : i32, i32
  }
}

</mosaic_0001>

<bundles_post_ra>
// kernel: tpu_custom_call.1
= control target key start
LH: loop header
LB: loop body
LE: loop exit
PB: predicated region body
PF: predicated region fallthrough
CT: control target
= control target key end

     0   :  { %8 = vsyncpa [#allocation3], 0  ;;  %s451_s0 = inlined_call_operand.hbm [shape: f32[8,1024], index: 0, kind: input, shape index: {}]   ;;  %s452_s1 = inlined_call_operand.hbm [shape: f32[1,1024], index: 1, kind: input, shape index: {}]   ;;  %s453_s2 = inlined_call_operand.hbm [shape: f32[1,1024], index: 2, kind: input, shape index: {}]   ;;  %s454_s3 = inlined_call_operand.hbm [shape: f32[8,1024], index: 3, kind: output, shape index: {}]  }
   0x1   :  { %9 = vsyncpa [#allocation6], 0 }
   0x2   :  { %10 = vsyncpa [#allocation4], 0  ;;  %s331_s12 = smov [#allocation5]   ;;  %s332_s14 = smov [#allocation2]  }
   0x3   :  { %s27_s13 = sshll.u32 %s331_s12, 4  ;;  %s17_s15 = sshll.u32 %s332_s14, 4  ;;  %s28_s13 = int_to_ptr.vmem [resolvable:$true] %s27_s13  ;;  %s18_s15 = int_to_ptr.vmem [resolvable:$true] %s17_s15 }
   0x4   :  { %s237_s18 = scalar_lea.hbm %s452_s1, 128 }
   0x5   :  { %p238_p0 = scmp.ne.s32.totalorder %s452_s1, %s237_s18  ;;  %p241_p1 = scmp.lt.u32.totalorder %s237_s18, %s452_s1 }
   0x7   :  { %p243_p2 = pnand %p241_p1, %p238_p0 }
   0x9   :  { %246 = shalt.err (!%p243_p2)
}
   0xa   :  { %s247_s23 = scalar_lea.vmem %s28_s13, 128  ;;  %p252_p4 = scmp.lt.s32.totalorder %s28_s13, %s28_s13 }
   0xb   :  { %p248_p3 = scmp.ne.s32.totalorder %s28_s13, %s247_s23  ;;  %p253_p5 = scmp.lt.s32.totalorder %s247_s23, %s247_s23 }
   0xd   :  { %p254_p6 = por %p253_p5, %p252_p4 }
   0xf   :  { %p255_p7 = pnand %p254_p6, %p248_p3 }
  0x11   :  { %258 = shalt.err (!%p255_p7)
}
  0x12   :  { %30 = dma.hbm_to_vmem [thread:$0]  %s452_s1, 128, %s28_s13, [#allocation6]  }
  0x13   :  { %s259_s28 = scalar_lea.hbm %s451_s0, 1024 }
  0x14   :  { %p260_p8 = scmp.ne.s32.totalorder %s451_s0, %s259_s28  ;;  %p263_p9 = scmp.lt.u32.totalorder %s259_s28, %s451_s0 }
  0x16   :  { %p265_p10 = pnand %p263_p9, %p260_p8 }
  0x18   :  { %268 = shalt.err (!%p265_p10)
}
  0x19   :  { %s269_s6 = scalar_lea.vmem %s18_s15, 1024  ;;  %p274_p12 = scmp.lt.s32.totalorder %s18_s15, %s18_s15 }
  0x1a   :  { %p270_p11 = scmp.ne.s32.totalorder %s18_s15, %s269_s6  ;;  %p275_p13 = scmp.lt.s32.totalorder %s269_s6, %s269_s6 }
  0x1c   :  { %p276_p0 = por %p275_p13, %p274_p12 }
  0x1e   :  { %p277_p1 = pnand %p276_p0, %p270_p11 }
  0x20   :  { %280 = shalt.err (!%p277_p1)
}
  0x21   :  { %20 = dma.hbm_to_vmem [thread:$0]  %s451_s0, 1024, %s18_s15, [#allocation3]  }
  0x22   :  { %s333_s8 = smov [#allocation7]   ;;  %s281_s12 = scalar_lea.hbm %s453_s2, 128 }
  0x23   :  { %s37_s9 = sshll.u32 %s333_s8, 4  ;;  %p282_p2 = scmp.ne.s32.totalorder %s453_s2, %s281_s12  ;;  %s38_s9 = int_to_ptr.vmem [resolvable:$true] %s37_s9 }
  0x24   :  { %p285_p3 = scmp.lt.u32.totalorder %s281_s12, %s453_s2 }
  0x26   :  { %p287_p4 = pnand %p285_p3, %p282_p2 }
  0x28   :  { %290 = shalt.err (!%p287_p4)
}
  0x29   :  { %s291_s18 = scalar_lea.vmem %s38_s9, 128  ;;  %p296_p6 = scmp.lt.s32.totalorder %s38_s9, %s38_s9 }
  0x2a   :  { %p292_p5 = scmp.ne.s32.totalorder %s38_s9, %s291_s18  ;;  %p297_p7 = scmp.lt.s32.totalorder %s291_s18, %s291_s18 }
  0x2c   :  { %p298_p8 = por %p297_p7, %p296_p6 }
  0x2e   :  { %p299_p9 = pnand %p298_p8, %p292_p5 }
  0x30   :  { %302 = shalt.err (!%p299_p9)
}
  0x31   :  { %40 = dma.hbm_to_vmem [thread:$0]  %s453_s2, 128, %s38_s9, [#allocation6]  }
  0x32   :  { %325 = dma.done.wait [#allocation3], 1024  }
  0x33   :  { %326 = vsyncadd [#allocation3], 4294966272 }
  0x34   :  { %327 = dma.done.wait [#allocation6], 256  }
  0x35   :  { %328 = vsyncadd [#allocation6], 4294967040  ;;  %v391_v0 = vld [vmem:[#allocation2] sm:$0xff]  ;;  %v393_v1 = vld [vmem:[#allocation2 + $0x8] sm:$0xff]  ;;  %v110_v35 = vlaneseq  ;;  %s334_s2 = smov [#allocation8]  }
  0x36   :  { %v395_v2 = vld [vmem:[#allocation2 + $0x10] sm:$0xff]  ;;  %v60_v3 = vadd.f32 %v393_v1, %v391_v0  ;;  %v69_v4 = vmul.f32 %v391_v0, %v391_v0  ;;  %v70_v5 = vmul.f32 %v393_v1, %v393_v1  ;;  %v405_v7 = vld [vmem:[#allocation2 + $0x18] sm:$0xff]  ;;  %v410_v11 = vld [vmem:[#allocation2 + $0x20] sm:$0xff]  ;;  %s221_s19 = sshll.u32 %s334_s2, 4  ;;  %s222_s19 = int_to_ptr.vmem [resolvable:$true] %s221_s19 }
  0x37   :  { %v71_v6 = vmul.f32 %v395_v2, %v395_v2  ;;  %v72_v9 = vmul.f32 %v405_v7, %v405_v7  ;;  %v73_v13 = vmul.f32 %v410_v11, %v410_v11  ;;  %v415_v15 = vld [vmem:[#allocation2 + $0x28] sm:$0xff]  ;;  %v420_v19 = vld [vmem:[#allocation2 + $0x30] sm:$0xff]  ;;  %v425_v23 = vld [vmem:[#allocation2 + $0x38] sm:$0xff]  ;;  %v111_v38 = vshrl.u32 %v110_v35, 7  ;;  %s303_s20 = scalar_lea.vmem %s222_s19, 1024  ;;  %p308_p11 = scmp.lt.s32.totalorder %s222_s19, %s222_s19 }
  0x38   :  { %v61_v8 = vadd.f32 %v60_v3, %v395_v2  ;;  %v77_v10 = vadd.f32 %v70_v5, %v69_v4  ;;  %v74_v17 = vmul.f32 %v415_v15, %v415_v15  ;;  %v75_v21 = vmul.f32 %v420_v19, %v420_v19  ;;  %v58_v44 = vld [vmem:[#allocation5] sm:$0xff]  ;;  %v59_v49 = vld [vmem:[#allocation7] sm:$0xff]  ;;  %p304_p10 = scmp.ne.s32.totalorder %s222_s19, %s303_s20  ;;  %p309_p12 = scmp.lt.s32.totalorder %s303_s20, %s303_s20 }
  0x39   :  { %v76_v25 = vmul.f32 %v425_v23, %v425_v23  ;;  %v112_v40 = vsub.s32 0, %v111_v38  ;;  %v116_v41 = vsub.s32 1, %v111_v38  ;;  %v120_v42 = vsub.s32 2, %v111_v38 }
  0x3a   :  { %v62_v12 = vadd.f32 %v61_v8, %v405_v7  ;;  %v78_v14 = vadd.f32 %v77_v10, %v71_v6  ;;  %v124_v43 = vsub.s32 3, %v111_v38  ;;  %v128_v45 = vsub.s32 4, %v111_v38  ;;  %p310_p13 = por %p309_p12, %p308_p11 }
  0x3b   :  { %v132_v46 = vsub.s32 5, %v111_v38  ;;  %v136_v47 = vsub.s32 6, %v111_v38  ;;  %v140_v48 = vsub.s32 7, %v111_v38  ;;  %v113_v50 = vrot.slane %v58_v44, %v112_v40 }
  0x3c   :  { %v63_v16 = vadd.f32 %v62_v12, %v410_v11  ;;  %v79_v18 = vadd.f32 %v78_v14, %v72_v9  ;;  %v117_v51 = vrot.slane %v58_v44, %v116_v41  ;;  %v121_v52 = vrot.slane %v58_v44, %v120_v42  ;;  %p311_p0 = pnand %p310_p13, %p304_p10 }
  0x3d   :  { %v125_v53 = vrot.slane %v58_v44, %v124_v43  ;;  %v129_v54 = vrot.slane %v58_v44, %v128_v45  ;;  %v133_v55 = vrot.slane %v58_v44, %v132_v46  ;;  %v137_v56 = vrot.slane %v58_v44, %v136_v47 }
  0x3e   :  { %v64_v20 = vadd.f32 %v63_v16, %v415_v15  ;;  %v80_v22 = vadd.f32 %v79_v18, %v73_v13  ;;  %v141_v57 = vrot.slane %v58_v44, %v140_v48  ;;  %v162_v58 = vrot.slane %v59_v49, %v112_v40 }
  0x3f   :  { %v166_v59 = vrot.slane %v59_v49, %v116_v41  ;;  %v170_v60 = vrot.slane %v59_v49, %v120_v42  ;;  %v174_v61 = vrot.slane %v59_v49, %v124_v43  ;;  %v178_v62 = vrot.slane %v59_v49, %v128_v45 }
  0x40   :  { %v65_v24 = vadd.f32 %v64_v20, %v420_v19  ;;  %v81_v26 = vadd.f32 %v80_v22, %v74_v17  ;;  %v182_v63 = vrot.slane %v59_v49, %v132_v46  ;;  %v186_v3 = vrot.slane %v59_v49, %v136_v47 }
  0x41   :  { %v190_v4 = vrot.slane %v59_v49, %v140_v48 }
  0x42   :  { %v66_v27 = vadd.f32 %v65_v24, %v425_v23  ;;  %v82_v28 = vadd.f32 %v81_v26, %v75_v21 }
  0x44   :  { %67 = vadd.xlane.f32.xlu0 %v66_v27  ;;  %v83_v29 = vadd.f32 %v82_v28, %v76_v25 }
  0x48   :  { %84 = vadd.xlane.f32.xlu0 %v83_v29 }
  0xd1   :  { %v68_v30 = vpop.xlane.xlu0 %67 }
  0xd2   :  { %v86_v31 = vmul.f32 0.0009765625, %v68_v30 }
  0xd4   :  { %v88_v33 = vmul.f32 %v86_v31, %v86_v31  ;;  %v93_v5 = vsub.f32 %v391_v0, %v86_v31  ;;  %v94_v6 = vsub.f32 %v393_v1, %v86_v31  ;;  %v95_v8 = vsub.f32 %v395_v2, %v86_v31 }
  0xd5   :  { %v85_v32 = vpop.xlane.xlu0 %84  ;;  %v96_v9 = vsub.f32 %v405_v7, %v86_v31  ;;  %v97_v12 = vsub.f32 %v410_v11, %v86_v31  ;;  %v98_v13 = vsub.f32 %v415_v15, %v86_v31  ;;  %v99_v14 = vsub.f32 %v420_v19, %v86_v31 }
  0xd6   :  { %v87_v34 = vmul.f32 0.0009765625, %v85_v32  ;;  %v100_v16 = vsub.f32 %v425_v23, %v86_v31 }
  0xd8   :  { %v89_v36 = vsub.f32 %v87_v34, %v88_v33 }
  0xda   :  { %v90_v37 = vmax.f32 %v89_v36, 0.0 }
  0xdc   :  { %v91_v39 = vadd.f32 1e-05, %v90_v37 }
  0xde   :  { %235 = vrsqrt.f32 %v91_v39 }
  0xe8   :  { %v236_v10 = vpop.eup %235 }
  0xe9   :  { %v101_v17 = vmul.f32 %v236_v10, %v93_v5  ;;  %v102_v18 = vmul.f32 %v236_v10, %v94_v6  ;;  %v103_v20 = vmul.f32 %v236_v10, %v95_v8  ;;  %v104_v21 = vmul.f32 %v236_v10, %v96_v9 }
  0xea   :  { %v105_v0 = vmul.f32 %v236_v10, %v97_v12  ;;  %v106_v22 = vmul.f32 %v236_v10, %v98_v13  ;;  %v107_v1 = vmul.f32 %v236_v10, %v99_v14  ;;  %v108_v24 = vmul.f32 %v236_v10, %v100_v16 }
  0xeb   :  { %v150_v2 = vmul.f32 %v113_v50, %v101_v17  ;;  %v151_v25 = vmul.f32 %v117_v51, %v102_v18  ;;  %v152_v7 = vmul.f32 %v121_v52, %v103_v20  ;;  %v153_v26 = vmul.f32 %v125_v53, %v104_v21 }
  0xec   :  { %v154_v11 = vmul.f32 %v129_v54, %v105_v0  ;;  %v155_v15 = vmul.f32 %v133_v55, %v106_v22  ;;  %v156_v27 = vmul.f32 %v137_v56, %v107_v1  ;;  %v157_v19 = vmul.f32 %v141_v57, %v108_v24 }
  0xed   :  { %v199_v28 = vadd.f32 %v162_v58, %v150_v2  ;;  %v200_v23 = vadd.f32 %v166_v59, %v151_v25  ;;  %v201_v29 = vadd.f32 %v170_v60, %v152_v7  ;;  %v202_v30 = vadd.f32 %v174_v61, %v153_v26 }
  0xee   :  { %v203_v31 = vadd.f32 %v178_v62, %v154_v11  ;;  %v204_v32 = vadd.f32 %v182_v63, %v155_v15  ;;  %v205_v33 = vadd.f32 %v186_v3, %v156_v27  ;;  %v206_v34 = vadd.f32 %v190_v4, %v157_v19 }
  0xef   :  { %207 = vst [vmem:[#allocation8] sm:$0xff] %v199_v28  ;;  %208 = vst [vmem:[#allocation8 + $0x8] sm:$0xff] %v200_v23 }
  0xf0   :  { %209 = vst [vmem:[#allocation8 + $0x10] sm:$0xff] %v201_v29  ;;  %210 = vst [vmem:[#allocation8 + $0x18] sm:$0xff] %v202_v30 }
  0xf1   :  { %211 = vst [vmem:[#allocation8 + $0x20] sm:$0xff] %v203_v31  ;;  %212 = vst [vmem:[#allocation8 + $0x28] sm:$0xff] %v204_v32 }
  0xf2   :  { %213 = vst [vmem:[#allocation8 + $0x30] sm:$0xff] %v205_v33  ;;  %214 = vst [vmem:[#allocation8 + $0x38] sm:$0xff] %v206_v34 }
  0xf3   :  { %314 = shalt.err (!%p311_p0)
}
  0xf4   :  { %s315_s23 = scalar_lea.hbm %s454_s3, 1024 }
  0xf5   :  { %p316_p1 = scmp.ne.s32.totalorder %s454_s3, %s315_s23  ;;  %p319_p2 = scmp.lt.u32.totalorder %s315_s23, %s454_s3 }
  0xf7   :  { %p321_p3 = pnand %p319_p2, %p316_p1 }
  0xf9   :  { %324 = shalt.err (!%p321_p3)
}
  0xfa   :  { %224 = dma.vmem_to_hbm [thread:$0]  %s222_s19, 1024, %s454_s3, [#allocation4]  }
  0xfb   :  { %329 = dma.done.wait [#allocation4], 1024  }
  0xfc   :  { %330 = vsyncadd [#allocation4], 4294966272 }
  0xfd   :  { %228 = vsyncpa [#allocation3], 1 }
  0xfe   :  { %229 = vsyncpa [#allocation6], 1 }
  0xff   :  { %230 = vsyncpa [#allocation4], 1 }

</bundles_post_ra>
